<compile_context>
chip_gen: v6e
topology: v6e:2x2x1
jax: 0.10.0
libtpu: 0.0.40
codegen_flags: <defaults>
</compile_context>

<pallas_src>
import jax
import jax.numpy as jnp
from jax.experimental import pallas as pl
from jax.experimental.pallas import tpu as pltpu


def _self_attn_kernel(xq_ref, xkv_ref, wq_ref, wkv_ref, bq_ref, bkv_ref,
                      gamma_ref, o_ref, q_scr, m_scr, l_scr, acc_scr):
    kv_step = pl.program_id(2)
    cqk_pad = wq_ref.shape[0]

    # ---- once per (batch, q-tile): project q, reset online-softmax state ----
    @pl.when(kv_step == 0)
    def _init():
        xq = xq_ref[0].astype(jnp.bfloat16)                          # (C, tq)
        q = jnp.dot(wq_ref[...], xq,
                    preferred_element_type=jnp.float32) + bq_ref[...]
        q_scr[...] = q.astype(jnp.bfloat16)                          # (cqk_pad, tq)
        m_scr[...] = jnp.full_like(m_scr, -jnp.inf)
        l_scr[...] = jnp.zeros_like(l_scr)
        acc_scr[...] = jnp.zeros_like(acc_scr)

    # ---- fused K/V projection for this key tile -----------------------------
    xkv = xkv_ref[0].astype(jnp.bfloat16)                            # (C, tk)
    kvp = jnp.dot(wkv_ref[...], xkv,
                  preferred_element_type=jnp.float32) + bkv_ref[...]  # (cqk_pad+C, tk)
    # tiny (cqk_pad, tk) -> (tk, cqk_pad) transpose (XLU slot, ~1 vreg); makes
    # the energy matmul a plain NN MXU contraction (no large k.T copy).
    k_t = kvp[:cqk_pad, :].T.astype(jnp.bfloat16)                    # (tk, cqk_pad)
    v = kvp[cqk_pad:, :].astype(jnp.bfloat16)                        # (C, tk)

    # energy^T tile: s[j, i] = sum_c k[c, j] * q[c, i]
    s = jnp.dot(k_t, q_scr[...], preferred_element_type=jnp.float32)  # (tk, tq)

    # ---- online softmax over the key (sublane) axis; normalization deferred -
    m_prev = m_scr[...]                                              # (1, tq)
    m_new = jnp.maximum(m_prev, jnp.max(s, axis=0, keepdims=True))
    alpha = jnp.exp(m_prev - m_new)                                  # (1, tq)
    p = jnp.exp(s - m_new)                                           # (tk, tq)
    l_scr[...] = alpha * l_scr[...] + jnp.sum(p, axis=0, keepdims=True)
    acc_scr[...] = alpha * acc_scr[...] + jnp.dot(
        v, p.astype(jnp.bfloat16), preferred_element_type=jnp.float32)  # (C, tq)
    m_scr[...] = m_new

    # ---- once per (batch, q-tile): normalize, gamma-residual, store ---------
    @pl.when(kv_step == pl.num_programs(2) - 1)
    def _finalize():
        inv_l = pl.reciprocal(l_scr[...], approx=True)               # (1, tq)
        out = acc_scr[...] * inv_l                                   # (C, tq)
        o_ref[0] = (gamma_ref[0, 0] * out + xq_ref[0]).astype(o_ref.dtype)


def _pick_tile(n):
    # 256-aligned tiles suit the v6e/v7x 256x256 MXU for large N; 128 is safe
    # everywhere (v5e's 128x128 MXU) and exercises multi-tile accumulation.
    if n % 256 == 0 and n >= 1024:
        return 256
    if n % 128 == 0:
        return 128
    return n  # tiny / odd N: one full-width tile


@jax.jit
def self_attention_pallas(x_nchw, wq, wk, wv, bq, bk, bv, gamma):
    """x: (B,C,W,H) f32. wq/wk: (Cqk,C), wv: (C,C), bq/bk: (Cqk,), bv: (C,),
    gamma: (1,). Returns (B,C,W,H) f32."""
    B, C, W, H = x_nchw.shape
    N = W * H
    Cqk = wq.shape[0]
    cqk_pad = max(8, ((Cqk + 7) // 8) * 8)

    t = _pick_tile(N)
    nq = N // t
    nk = N // t

    # Free reshape: NCHW is already channel-major / spatial-minor.
    x_cn = x_nchw.reshape(B, C, N)

    # Pad q/k projections to an 8-row multiple so the fused [K;V] result can be
    # sliced at sublane-aligned offsets; padded rows are all-zero (weights and
    # biases), so they contribute nothing to the energy. Weights pre-cast to
    # bf16 for the MXU; biases stay f32 (added to the f32 accumulator).
    f32 = jnp.float32
    wq_p = jnp.zeros((cqk_pad, C), f32).at[:Cqk].set(wq).astype(jnp.bfloat16)
    wk_p = jnp.zeros((cqk_pad, C), f32).at[:Cqk].set(wk)
    wkv = jnp.concatenate([wk_p, wv.astype(f32)], axis=0).astype(jnp.bfloat16)
    bq_p = jnp.zeros((cqk_pad, 1), f32).at[:Cqk, 0].set(bq)
    bk_p = jnp.zeros((cqk_pad, 1), f32).at[:Cqk, 0].set(bk)
    bkv = jnp.concatenate([bk_p, bv.reshape(C, 1).astype(f32)], axis=0)
    gamma_s = gamma.reshape(1, 1).astype(f32)

    out_cn = pl.pallas_call(
        _self_attn_kernel,
        out_shape=jax.ShapeDtypeStruct((B, C, N), x_nchw.dtype),
        grid_spec=pltpu.PrefetchScalarGridSpec(
            num_scalar_prefetch=0,
            grid=(B, nq, nk),
            in_specs=[
                pl.BlockSpec((1, C, t), lambda b, qi, ki: (b, 0, qi)),       # x (q/residual tile)
                pl.BlockSpec((1, C, t), lambda b, qi, ki: (b, 0, ki)),       # x (k/v tile)
                pl.BlockSpec((cqk_pad, C), lambda b, qi, ki: (0, 0)),        # Wq (bf16, padded)
                pl.BlockSpec((cqk_pad + C, C), lambda b, qi, ki: (0, 0)),    # [Wk;Wv] fused (bf16)
                pl.BlockSpec((cqk_pad, 1), lambda b, qi, ki: (0, 0)),        # bq (f32)
                pl.BlockSpec((cqk_pad + C, 1), lambda b, qi, ki: (0, 0)),    # [bk;bv] (f32)
                pl.BlockSpec(memory_space=pltpu.MemorySpace.SMEM),           # gamma scalar
            ],
            out_specs=pl.BlockSpec((1, C, t), lambda b, qi, ki: (b, 0, qi)),
            scratch_shapes=[
                pltpu.VMEM((cqk_pad, t), jnp.bfloat16),   # q tile (computed once per q-tile)
                pltpu.VMEM((1, t), jnp.float32),          # running max
                pltpu.VMEM((1, t), jnp.float32),          # running denom
                pltpu.VMEM((C, t), jnp.float32),          # output accumulator
            ],
        ),
        compiler_params=pltpu.CompilerParams(
            dimension_semantics=("parallel", "parallel", "arbitrary"),
            vmem_limit_bytes=32 * 1024 * 1024,
        ),
    )(x_cn, x_cn, wq_p, wkv, bq_p, bkv, gamma_s)

    return out_cn.reshape(B, C, W, H)


def self_attention_ref(x, wq, wk, wv, bq, bk, bv, gamma):
    """Pure-JAX f32 reference mirroring the PyTorch forward exactly."""
    B, C, W, H = x.shape
    N = W * H
    hp = jax.lax.Precision.HIGHEST
    xf = x.reshape(B, C, N)
    q = jnp.einsum('oc,bcn->bon', wq, xf, precision=hp) + bq[None, :, None]
    k = jnp.einsum('oc,bcn->bon', wk, xf, precision=hp) + bk[None, :, None]
    v = jnp.einsum('oc,bcn->bon', wv, xf, precision=hp) + bv[None, :, None]
    energy = jnp.einsum('bci,bcj->bij', q, k, precision=hp)          # (B, N, N)
    attn = jax.nn.softmax(energy, axis=-1)
    out = jnp.einsum('bcj,bij->bci', v, attn, precision=hp)          # (B, C, N)
    return gamma.reshape(()) * out.reshape(B, C, W, H) + x


if __name__ == "__main__":
    key = jax.random.PRNGKey(0)
    B, C, W, H = 2, 16, 16, 16          # in_dim = 16 -> query/key channels = 2
    Cqk = max(C // 8, 1)

    ks = jax.random.split(key, 8)
    x = jax.random.normal(ks[0], (B, C, W, H), dtype=jnp.float32)
    # nn.Conv2d(in, out, 1) weights stored as (out, in) matrices.
    wq = jax.random.normal(ks[1], (Cqk, C), dtype=jnp.float32) * 0.1
    wk = jax.random.normal(ks[2], (Cqk, C), dtype=jnp.float32) * 0.1
    wv = jax.random.normal(ks[3], (C, C), dtype=jnp.float32) * 0.1
    bq = jax.random.normal(ks[4], (Cqk,), dtype=jnp.float32) * 0.1
    bk = jax.random.normal(ks[5], (Cqk,), dtype=jnp.float32) * 0.1
    bv = jax.random.normal(ks[6], (C,), dtype=jnp.float32) * 0.1
    # PyTorch inits gamma to zero; use a nonzero value so the attention path
    # is actually exercised by the check.
    gamma = jnp.array([0.5], dtype=jnp.float32)

    out = jax.block_until_ready(
        self_attention_pallas(x, wq, wk, wv, bq, bk, bv, gamma))
    ref = self_attention_ref(x, wq, wk, wv, bq, bk, bv, gamma)

    assert out.shape == (B, C, W, H)
    err = float(jnp.max(jnp.abs(out - ref)))
    # bf16 MXU operands + approx reciprocal -> loosened tolerance vs f32 ref.
    assert jnp.allclose(out, ref, atol=2e-2, rtol=2e-2), f"max abs err {err}"

    print("KERNEL_OK")
</pallas_src>

<mosaic_0001>
module attributes {stable_mosaic.version = 11 : i64} {
  func.func @_self_attn_kernel(%arg0: i32, %arg1: i32, %arg2: i32, %arg3: memref<1x16x128xf32, #tpu.memory_space<vmem>>, %arg4: memref<1x16x128xf32, #tpu.memory_space<vmem>>, %arg5: memref<8x16xbf16, #tpu.memory_space<vmem>>, %arg6: memref<24x16xbf16, #tpu.memory_space<vmem>>, %arg7: memref<8x1xf32, #tpu.memory_space<vmem>>, %arg8: memref<24x1xf32, #tpu.memory_space<vmem>>, %arg9: memref<1x1xf32, #tpu.memory_space<smem>>, %arg10: memref<1x16x128xf32, #tpu.memory_space<vmem>>, %arg11: memref<8x128xbf16, #tpu.memory_space<vmem>>, %arg12: memref<1x128xf32, #tpu.memory_space<vmem>>, %arg13: memref<1x128xf32, #tpu.memory_space<vmem>>, %arg14: memref<16x128xf32, #tpu.memory_space<vmem>>) attributes {dimension_semantics = [#tpu.dimension_semantics<parallel>, #tpu.dimension_semantics<parallel>, #tpu.dimension_semantics<arbitrary>], iteration_bounds = array<i64: 2, 2, 2>, scalar_prefetch = 0 : i64, scratch_operands = 4 : i64, tpu.core_type = #tpu.core_type<tc>, window_params = [{transform_indices = @transform_0, window_bounds = array<i64: 1, 16, 128>}, {transform_indices = @transform_1, window_bounds = array<i64: 1, 16, 128>}, {pipeline_mode = #tpu.pipeline_mode<synchronous>, transform_indices = @transform_2, window_bounds = array<i64: 8, 16>}, {pipeline_mode = #tpu.pipeline_mode<synchronous>, transform_indices = @transform_3, window_bounds = array<i64: 24, 16>}, {pipeline_mode = #tpu.pipeline_mode<synchronous>, transform_indices = @transform_4, window_bounds = array<i64: 8, 1>}, {pipeline_mode = #tpu.pipeline_mode<synchronous>, transform_indices = @transform_5, window_bounds = array<i64: 24, 1>}, {transform_indices = @transform_6, window_bounds = array<i64: 1, 1>}, {transform_indices = @transform_7, window_bounds = array<i64: 1, 16, 128>}]} {
    %c0_i32 = arith.constant 0 : i32
    %0 = arith.cmpi eq, %arg2, %c0_i32 : i32
    %1 = arith.extui %0 : i1 to i32
    %c0_i32_0 = arith.constant 0 : i32
    %2 = arith.cmpi ne, %1, %c0_i32_0 : i32
    scf.if %2 {
      %c0_26 = arith.constant 0 : index
      %c0_27 = arith.constant 0 : index
      %c0_28 = arith.constant 0 : index
      %44 = vector.load %arg3[%c0_26, %c0_27, %c0_28] : memref<1x16x128xf32, #tpu.memory_space<vmem>>, vector<1x16x128xf32>
      %45 = vector.shape_cast %44 : vector<1x16x128xf32> to vector<16x128xf32>
      %46 = arith.truncf %45 : vector<16x128xf32> to vector<16x128xbf16>
      %c0_29 = arith.constant 0 : index
      %c0_30 = arith.constant 0 : index
      %47 = vector.load %arg5[%c0_29, %c0_30] : memref<8x16xbf16, #tpu.memory_space<vmem>>, vector<8x16xbf16>
      %cst_31 = arith.constant dense<0.000000e+00> : vector<8x128xf32>
      %48 = tpu.matmul %47, %46, %cst_31 {dimension_numbers = #tpu.dot_dimension_numbers<[1], [0], [0], [1], [0, 0, 1, 1], [], []>} : vector<8x16xbf16>, vector<16x128xbf16>, vector<8x128xf32> -> vector<8x128xf32>
      %c0_32 = arith.constant 0 : index
      %c0_33 = arith.constant 0 : index
      %49 = vector.load %arg7[%c0_32, %c0_33] : memref<8x1xf32, #tpu.memory_space<vmem>>, vector<8x1xf32>
      %50 = vector.broadcast %49 : vector<8x1xf32> to vector<8x128xf32>
      %51 = arith.addf %48, %50 : vector<8x128xf32>
      %52 = arith.truncf %51 : vector<8x128xf32> to vector<8x128xbf16>
      %c0_34 = arith.constant 0 : index
      %c0_35 = arith.constant 0 : index
      %53 = vector.load %arg11[%c0_34, %c0_35] : memref<8x128xbf16, #tpu.memory_space<vmem>>, vector<8x128xbf16>
      tpu.vector_store %arg11[%c0_34, %c0_35], %52 {strides = array<i32>} : memref<8x128xbf16, #tpu.memory_space<vmem>>, vector<8x128xbf16>,
      %cst_36 = arith.constant 0xFF800000 : f32
      %54 = vector.broadcast %cst_36 : f32 to vector<1x128xf32>
      %c0_37 = arith.constant 0 : index
      %c0_38 = arith.constant 0 : index
      %55 = vector.load %arg12[%c0_37, %c0_38] : memref<1x128xf32, #tpu.memory_space<vmem>>, vector<1x128xf32>
      tpu.vector_store %arg12[%c0_37, %c0_38], %54 {strides = array<i32>} : memref<1x128xf32, #tpu.memory_space<vmem>>, vector<1x128xf32>,
      %cst_39 = arith.constant 0.000000e+00 : f32
      %56 = vector.broadcast %cst_39 : f32 to vector<1x128xf32>
      %c0_40 = arith.constant 0 : index
      %c0_41 = arith.constant 0 : index
      %57 = vector.load %arg13[%c0_40, %c0_41] : memref<1x128xf32, #tpu.memory_space<vmem>>, vector<1x128xf32>
      tpu.vector_store %arg13[%c0_40, %c0_41], %56 {strides = array<i32>} : memref<1x128xf32, #tpu.memory_space<vmem>>, vector<1x128xf32>,
      %cst_42 = arith.constant 0.000000e+00 : f32
      %58 = vector.broadcast %cst_42 : f32 to vector<16x128xf32>
      %c0_43 = arith.constant 0 : index
      %c0_44 = arith.constant 0 : index
      %59 = vector.load %arg14[%c0_43, %c0_44] : memref<16x128xf32, #tpu.memory_space<vmem>>, vector<16x128xf32>
      tpu.vector_store %arg14[%c0_43, %c0_44], %58 {strides = array<i32>} : memref<16x128xf32, #tpu.memory_space<vmem>>, vector<16x128xf32>,
    } else {
    }
    %c0 = arith.constant 0 : index
    %c0_1 = arith.constant 0 : index
    %c0_2 = arith.constant 0 : index
    %3 = vector.load %arg4[%c0, %c0_1, %c0_2] : memref<1x16x128xf32, #tpu.memory_space<vmem>>, vector<1x16x128xf32>
    %4 = vector.shape_cast %3 : vector<1x16x128xf32> to vector<16x128xf32>
    %5 = arith.truncf %4 : vector<16x128xf32> to vector<16x128xbf16>
    %c0_3 = arith.constant 0 : index
    %c0_4 = arith.constant 0 : index
    %6 = vector.load %arg6[%c0_3, %c0_4] : memref<24x16xbf16, #tpu.memory_space<vmem>>, vector<24x16xbf16>
    %cst = arith.constant dense<0.000000e+00> : vector<24x128xf32>
    %7 = tpu.matmul %6, %5, %cst {dimension_numbers = #tpu.dot_dimension_numbers<[1], [0], [0], [1], [0, 0, 1, 1], [], []>} : vector<24x16xbf16>, vector<16x128xbf16>, vector<24x128xf32> -> vector<24x128xf32>
    %c0_5 = arith.constant 0 : index
    %c0_6 = arith.constant 0 : index
    %8 = vector.load %arg8[%c0_5, %c0_6] : memref<24x1xf32, #tpu.memory_space<vmem>>, vector<24x1xf32>
    %9 = vector.broadcast %8 : vector<24x1xf32> to vector<24x128xf32>
    %10 = arith.addf %7, %9 : vector<24x128xf32>
    %11 = vector.extract_strided_slice %10 {offsets = [0, 0], sizes = [8, 128], strides = [1, 1]} : vector<24x128xf32> to vector<8x128xf32>
    %12 = tpu.transpose %11, [1, 0] : vector<8x128xf32> -> vector<128x8xf32>
    %13 = arith.truncf %12 : vector<128x8xf32> to vector<128x8xbf16>
    %14 = vector.extract_strided_slice %10 {offsets = [8, 0], sizes = [16, 128], strides = [1, 1]} : vector<24x128xf32> to vector<16x128xf32>
    %15 = arith.truncf %14 : vector<16x128xf32> to vector<16x128xbf16>
    %c0_7 = arith.constant 0 : index
    %c0_8 = arith.constant 0 : index
    %16 = vector.load %arg11[%c0_7, %c0_8] : memref<8x128xbf16, #tpu.memory_space<vmem>>, vector<8x128xbf16>
    %cst_9 = arith.constant dense<0.000000e+00> : vector<128x128xf32>
    %17 = tpu.matmul %13, %16, %cst_9 {dimension_numbers = #tpu.dot_dimension_numbers<[1], [0], [0], [1], [0, 0, 1, 1], [], []>} : vector<128x8xbf16>, vector<8x128xbf16>, vector<128x128xf32> -> vector<128x128xf32>
    %c0_10 = arith.constant 0 : index
    %c0_11 = arith.constant 0 : index
    %18 = vector.load %arg12[%c0_10, %c0_11] : memref<1x128xf32, #tpu.memory_space<vmem>>, vector<1x128xf32>
    %cst_12 = arith.constant dense<0xFF800000> : vector<128xf32>
    %19 = vector.multi_reduction <maximumf>, %17, %cst_12 [0] : vector<128x128xf32> to vector<128xf32>
    %20 = vector.shape_cast %19 : vector<128xf32> to vector<1x128xf32>
    %21 = arith.maximumf %18, %20 : vector<1x128xf32>
    %22 = arith.subf %18, %21 : vector<1x128xf32>
    %23 = math.exp %22 : vector<1x128xf32>
    %24 = vector.broadcast %21 : vector<1x128xf32> to vector<128x128xf32>
    %25 = arith.subf %17, %24 : vector<128x128xf32>
    %26 = math.exp %25 : vector<128x128xf32>
    %c0_13 = arith.constant 0 : index
    %c0_14 = arith.constant 0 : index
    %27 = vector.load %arg13[%c0_13, %c0_14] : memref<1x128xf32, #tpu.memory_space<vmem>>, vector<1x128xf32>
    %28 = arith.mulf %23, %27 : vector<1x128xf32>
    %cst_15 = arith.constant dense<0.000000e+00> : vector<128xf32>
    %29 = vector.multi_reduction <add>, %26, %cst_15 [0] : vector<128x128xf32> to vector<128xf32>
    %30 = vector.shape_cast %29 : vector<128xf32> to vector<1x128xf32>
    %31 = arith.addf %28, %30 : vector<1x128xf32>
    %c0_16 = arith.constant 0 : index
    %c0_17 = arith.constant 0 : index
    %32 = vector.load %arg13[%c0_16, %c0_17] : memref<1x128xf32, #tpu.memory_space<vmem>>, vector<1x128xf32>
    tpu.vector_store %arg13[%c0_16, %c0_17], %31 {strides = array<i32>} : memref<1x128xf32, #tpu.memory_space<vmem>>, vector<1x128xf32>,
    %c0_18 = arith.constant 0 : index
    %c0_19 = arith.constant 0 : index
    %33 = vector.load %arg14[%c0_18, %c0_19] : memref<16x128xf32, #tpu.memory_space<vmem>>, vector<16x128xf32>
    %34 = vector.broadcast %23 : vector<1x128xf32> to vector<16x128xf32>
    %35 = arith.mulf %34, %33 : vector<16x128xf32>
    %36 = arith.truncf %26 : vector<128x128xf32> to vector<128x128xbf16>
    %cst_20 = arith.constant dense<0.000000e+00> : vector<16x128xf32>
    %37 = tpu.matmul %15, %36, %cst_20 {dimension_numbers = #tpu.dot_dimension_numbers<[1], [0], [0], [1], [0, 0, 1, 1], [], []>} : vector<16x128xbf16>, vector<128x128xbf16>, vector<16x128xf32> -> vector<16x128xf32>
    %38 = arith.addf %35, %37 : vector<16x128xf32>
    %c0_21 = arith.constant 0 : index
    %c0_22 = arith.constant 0 : index
    %39 = vector.load %arg14[%c0_21, %c0_22] : memref<16x128xf32, #tpu.memory_space<vmem>>, vector<16x128xf32>
    tpu.vector_store %arg14[%c0_21, %c0_22], %38 {strides = array<i32>} : memref<16x128xf32, #tpu.memory_space<vmem>>, vector<16x128xf32>,
    %c0_23 = arith.constant 0 : index
    %c0_24 = arith.constant 0 : index
    %40 = vector.load %arg12[%c0_23, %c0_24] : memref<1x128xf32, #tpu.memory_space<vmem>>, vector<1x128xf32>
    tpu.vector_store %arg12[%c0_23, %c0_24], %21 {strides = array<i32>} : memref<1x128xf32, #tpu.memory_space<vmem>>, vector<1x128xf32>,
    %c1_i32 = arith.constant 1 : i32
    %41 = arith.cmpi eq, %arg2, %c1_i32 : i32
    %42 = arith.extui %41 : i1 to i32
    %c0_i32_25 = arith.constant 0 : i32
    %43 = arith.cmpi ne, %42, %c0_i32_25 : i32
    scf.if %43 {
      %c0_26 = arith.constant 0 : index
      %c0_27 = arith.constant 0 : index
      %44 = vector.load %arg13[%c0_26, %c0_27] : memref<1x128xf32, #tpu.memory_space<vmem>>, vector<1x128xf32>
      %45 = tpu.reciprocal %44 {approx = true} : vector<1x128xf32> -> vector<1x128xf32>
      %c0_28 = arith.constant 0 : index
      %c0_29 = arith.constant 0 : index
      %46 = vector.load %arg14[%c0_28, %c0_29] : memref<16x128xf32, #tpu.memory_space<vmem>>, vector<16x128xf32>
      %47 = vector.broadcast %45 : vector<1x128xf32> to vector<16x128xf32>
      %48 = arith.mulf %46, %47 : vector<16x128xf32>
      %c0_30 = arith.constant 0 : index
      %c0_31 = arith.constant 0 : index
      %49 = memref.load %arg9[%c0_30, %c0_31] : memref<1x1xf32, #tpu.memory_space<smem>>
      %50 = vector.broadcast %49 : f32 to vector<16x128xf32>
      %51 = arith.mulf %50, %48 : vector<16x128xf32>
      %c0_32 = arith.constant 0 : index
      %c0_33 = arith.constant 0 : index
      %c0_34 = arith.constant 0 : index
      %52 = vector.load %arg3[%c0_32, %c0_33, %c0_34] : memref<1x16x128xf32, #tpu.memory_space<vmem>>, vector<1x16x128xf32>
      %53 = vector.shape_cast %52 : vector<1x16x128xf32> to vector<16x128xf32>
      %54 = arith.addf %51, %53 : vector<16x128xf32>
      %c0_35 = arith.constant 0 : index
      %c0_36 = arith.constant 0 : index
      %c0_37 = arith.constant 0 : index
      %55 = vector.load %arg10[%c0_35, %c0_36, %c0_37] : memref<1x16x128xf32, #tpu.memory_space<vmem>>, vector<1x16x128xf32>
      %56 = vector.shape_cast %55 : vector<1x16x128xf32> to vector<16x128xf32>
      %57 = vector.shape_cast %54 : vector<16x128xf32> to vector<1x16x128xf32>
      tpu.vector_store %arg10[%c0_35, %c0_36, %c0_37], %57 {strides = array<i32>} : memref<1x16x128xf32, #tpu.memory_space<vmem>>, vector<1x16x128xf32>,
    } else {
    }
    return
  }
  func.func @transform_0(%arg0: i32, %arg1: i32, %arg2: i32) -> (i32, i32, i32) {
    %c0_i32 = arith.constant 0 : i32
    %c0_i32_0 = arith.constant 0 : i32
    return %arg0, %c0_i32, %arg1 : i32, i32, i32
  }
  func.func @transform_1(%arg0: i32, %arg1: i32, %arg2: i32) -> (i32, i32, i32) {
    %c0_i32 = arith.constant 0 : i32
    %c0_i32_0 = arith.constant 0 : i32
    return %arg0, %c0_i32, %arg2 : i32, i32, i32
  }
  func.func @transform_2(%arg0: i32, %arg1: i32, %arg2: i32) -> (i32, i32) {
    %c0_i32 = arith.constant 0 : i32
    %c0_i32_0 = arith.constant 0 : i32
    %c0_i32_1 = arith.constant 0 : i32
    return %c0_i32, %c0_i32_0 : i32, i32
  }
  func.func @transform_3(%arg0: i32, %arg1: i32, %arg2: i32) -> (i32, i32) {
    %c0_i32 = arith.constant 0 : i32
    %c0_i32_0 = arith.constant 0 : i32
    %c0_i32_1 = arith.constant 0 : i32
    return %c0_i32, %c0_i32_0 : i32, i32
  }
  func.func @transform_4(%arg0: i32, %arg1: i32, %arg2: i32) -> (i32, i32) {
    %c0_i32 = arith.constant 0 : i32
    %c0_i32_0 = arith.constant 0 : i32
    %c0_i32_1 = arith.constant 0 : i32
    return %c0_i32, %c0_i32_0 : i32, i32
  }
  func.func @transform_5(%arg0: i32, %arg1: i32, %arg2: i32) -> (i32, i32) {
    %c0_i32 = arith.constant 0 : i32
    %c0_i32_0 = arith.constant 0 : i32
    %c0_i32_1 = arith.constant 0 : i32
    return %c0_i32, %c0_i32_0 : i32, i32
  }
  func.func @transform_6(%arg0: i32, %arg1: i32, %arg2: i32) -> (i32, i32) {
    %c0_i32 = arith.constant 0 : i32
    %c0_i32_0 = arith.constant 0 : i32
    %c0_i32_1 = arith.constant 0 : i32
    return %c0_i32, %c0_i32_0 : i32, i32
  }
  func.func @transform_7(%arg0: i32, %arg1: i32, %arg2: i32) -> (i32, i32, i32) {
    %c0_i32 = arith.constant 0 : i32
    %c0_i32_0 = arith.constant 0 : i32
    return %arg0, %c0_i32, %arg1 : i32, i32, i32
  }
}

</mosaic_0001>

<bundles_post_ra>
// kernel: self_attention_pallas.1
= control target key start
LH: loop header
LB: loop body
LE: loop exit
PB: predicated region body
PF: predicated region fallthrough
CT: control target
= control target key end

     0   :  { %s1736_s0 = inlined_call_operand.vmem [shape: f32[2,16,256], index: 0, kind: input, shape index: {}, may-alias: {0,1}]   ;;  %s1737_s1 = inlined_call_operand.vmem [shape: f32[2,16,256], index: 1, kind: input, shape index: {}, may-alias: {0,1}]   ;;  %s1738_s2 = inlined_call_operand.vmem [shape: bf16[8,16], index: 2, kind: input, shape index: {}]   ;;  %s1739_s3 = inlined_call_operand.vmem [shape: bf16[24,16], index: 3, kind: input, shape index: {}]   ;;  %s1740_s4 = inlined_call_operand.vmem [shape: f32[8,1], index: 4, kind: input, shape index: {}]   ;;  %s1741_s5 = inlined_call_operand.vmem [shape: f32[24,1], index: 5, kind: input, shape index: {}]   ;;  %s1742_s6 = inlined_call_operand.<no memory space> [shape: f32[1,1], index: 6, kind: input, shape index: {}]   ;;  %s1743_s7 = inlined_call_operand.vmem [shape: f32[2,16,256], index: 7, kind: output, shape index: {}]  }
   0x1   :  { %1748 = sst [smem:[#allocation15_spill]] %s1743_s7 }
   0x2   :  { %12 = sst [smem:[#allocation6]] %s1742_s6 }
   0x3   :  { %s1444_s26 = smov 0   ;;  %s1446_s27 = smov 0  }
   0x4   :  { %s1448_s28 = smov 0   ;;  %s1450_s29 = smov 0  }
   0x5   :  { %s1452_s30 = smov 0   ;;  %s1454_s8 = smov 0  }
   0x6   :  { %s1456_s9 = smov 0   ;;  %s1458_s10 = smov 0  }
   0x7   :  { %s1460_s11 = smov 0   ;;  %s1462_s12 = smov 0  }
   0x8   :  { %s1464_s6 = smov 0  }
   0x9 LB: > { %1749 = sst [smem:[#allocation10_spill]] %s1372_s8  ;;  %s30_s13 = sadd.s32 1, %s1380_s10  ;;  %s1392_s6 = sphi %s1464_s6, %s18_s6   ;;  %s1388_s12 = sphi %s1462_s12, %s1770_s12   ;;  %s1384_s11 = sphi %s1460_s11, %s1761_s11   ;;  %s1380_s10 = sphi %s1458_s10, %s1769_s10   ;;  %s1376_s9 = sphi %s1456_s9, %s1768_s9   ;;  %s1372_s8 = sphi %s1454_s8, %s1759_s8   ;;  %s1368_s30 = sphi %s1452_s30, %s1767_s30   ;;  %s1364_s29 = sphi %s1450_s29, %s1766_s29   ;;  %s1360_s28 = sphi %s1448_s28, %s1765_s28   ;;  %s1356_s27 = sphi %s1446_s27, %s1764_s27   ;;  %s1352_s26 = sphi %s1444_s26, %s1763_s26  }
   0xa   : > { %1750 = sst [smem:[#allocation11_spill]] %s1384_s11  ;;  %p31_p0 = scmp.ge.s32.totalorder %s30_s13, 2 }
   0xb   : > { %s33_s14 = sadd.s32 1, %s1384_s11  ;;  %p53_p1 = scmp.ne.s32.totalorder %s1364_s29, %s1360_s28 }
   0xc   : > { %s1772_s13 = smov (%p31_p0, %s30_s13), 0  ;;  %s1774_s14 = smov (!%p31_p0, %s33_s14), %s1384_s11 }
   0xd   : > { %1751 = sst [smem:[#allocation12_spill]] %s1772_s13  ;;  %p54_p2 = scmp.eq.s32.totalorder %s1392_s6, 0 }
   0xe   : > { %p35_p3 = scmp.ge.s32.totalorder %s1774_s14, 2  ;;  %s37_s15 = sadd.s32 1, %s1388_s12 }
   0xf   : > { %s1062_s16 = sadd.s32 4294967295, %s1392_s6   ;;  %p1512_p4 = por %p54_p2, %p53_p1 }
  0x10   : > { %s1776_s14 = smov (%p35_p3, %s1774_s14), 0  ;;  %s1778_s15 = smov (!%p35_p3, %s37_s15), %s1388_s12 }
  0x11   : > { %1753 = sst [smem:[#allocation13_spill]] %s1776_s14  ;;  %s70_s18 = ssub.s32 %s1380_s10, %s1772_s13 }
  0x12   : > { %p81_p5 = scmp.ne.s32.totalorder %s1356_s27, %s1352_s26  ;;  %p39_p6 = scmp.ge.s32.totalorder %s1778_s15, 2 }
  0x13   : > { %p218_p7 = scmp.eq.s32.totalorder %s1062_s16, 7  ;;  %s42_s19 = ssub.s32 %s1384_s11, %s1776_s14 }
  0x14   : > { %p1525_p8 = por %p81_p5, %p54_p2  ;;  %s1780_s15 = smov (%p39_p6, %s1778_s15), 0 }
  0x15   : > { %1755 = sst [smem:[#allocation14_spill]] %s1780_s15  ;;  %s46_s21 = sadd.s32 1, %s1364_s29 }
  0x16   : > { %p1535_p9 = por %p218_p7, %p53_p1  ;;  %s41_s23 = ssub.s32 %s1388_s12, %s1780_s15 }
  0x17   : > { %s74_s24 = sadd.s32 1, %s1356_s27  ;;  %s43_s25 = sor.u32 %s42_s19, %s41_s23 }
  0x18   : > { %s71_s13 = sor.u32 %s70_s18, %s41_s23  ;;  %p44_p10 = scmp.eq.s32.totalorder %s43_s25, 0 }
  0x19   : > { %p72_p11 = scmp.eq.s32.totalorder %s71_s13, 0  ;;  %p1065_p12 = scmp.ge.s32.totalorder %s1392_s6, 8 }
  0x1a   : > { %s1543_s16 = scalar_select %p44_p10, %s1364_s29, %s46_s21  }
  0x1b   : > { %s1546_s14 = scalar_select %p72_p11, %s1356_s27, %s74_s24  }
  0x1c   : > { %255 = sbr.rel (%p1065_p12) target bundleno = 47 (0x2f), region = 36 }
  0x21   : > { %258 = sbr.rel (!%p1512_p4) target bundleno = 40 (0x28), region = 40  ;;  %s260_s7 = sand.u32 (%p1512_p4), 1, %s1364_s29  }
  0x22   : > { %s1067_s15 = sshll.u32 (%p1512_p4), %s1388_s12, 2  ;;  %s1066_s8 = sshll.u32 (%p1512_p4), %s260_s7, 4 }
  0x23   : > { %s264_s19 = sadd.s32 (%p1512_p4), %s1384_s11, %s1067_s15  ;;  %s262_s24 = scalar_lea.vmem (%p1512_p4), [#allocation7], %s1066_s8 }
  0x24   : > { %s1068_s18 = sshll.u32 (%p1512_p4), %s264_s19, 3 }
  0x25   : > { %s266_s21 = scalar_lea.vmem (%p1512_p4), %s1736_s0, %s1068_s18 }
  0x26   : > { %v297_v0 = vld [vmem:[%s266_s21] sm:$0xff]  ;;  %v299_v1 = vld [vmem:[%s266_s21 + $0x10] sm:$0xff] }
  0x27   : > { %298 = vst [vmem:[%s262_s24] sm:$0xff] %v297_v0  ;;  %300 = vst [vmem:[%s262_s24 + $0x8] sm:$0xff] %v299_v1 }
  0x28 PF: > { %306 = sbr.rel (!%p1525_p8) target bundleno = 47 (0x2f), region = 78  ;;  %s308_s17 = sand.u32 (%p1525_p8), 1, %s1356_s27  }
  0x29   : > { %s1070_s7 = sshll.u32 (%p1525_p8), %s1388_s12, 2  ;;  %s1069_s15 = sshll.u32 (%p1525_p8), %s308_s17, 4 }
  0x2a   : > { %s312_s25 = sadd.s32 (%p1525_p8), %s1380_s10, %s1070_s7  ;;  %s310_s8 = scalar_lea.vmem (%p1525_p8), [#allocation8], %s1069_s15 }
  0x2b   : > { %s1071_s19 = sshll.u32 (%p1525_p8), %s312_s25, 3 }
  0x2c   : > { %s314_s18 = scalar_lea.vmem (%p1525_p8), %s1737_s1, %s1071_s19 }
  0x2d   : > { %v345_v2 = vld [vmem:[%s314_s18] sm:$0xff]  ;;  %v347_v3 = vld [vmem:[%s314_s18 + $0x10] sm:$0xff] }
  0x2e   : > { %346 = vst [vmem:[%s310_s8] sm:$0xff] %v345_v2  ;;  %348 = vst [vmem:[%s310_s8 + $0x8] sm:$0xff] %v347_v3 }
  0x2f PF: > { %p1072_p13 = scmp.ge.s32.totalorder %s1392_s6, 1  ;;  %p353_p0 = scmp.lt.s32.totalorder %s1392_s6, 9 }
  0x31   : > { %p354_p1 = pnand %p1072_p13, %p353_p0 }
  0x32   : > { %s360_s20 = sand.u32 (!%p354_p1), 1, %s1360_s28   ;;  %s367_s13 = sand.u32 (!%p354_p1), 1, %s1352_s26  }
  0x33   : > { %357 = sbr.rel (%p354_p1) target bundleno = 1174 (0x496), region = 116  ;;  %s1073_s21 = sshll.u32 (!%p354_p1), %s360_s20, 4 }
  0x34   : > { %s1569_s11 = sshll.u32 (!%p354_p1), %s367_s13, 4  ;;  %s1571_s24 = scalar_lea.vmem (!%p354_p1), [#allocation7], %s1073_s21 }
  0x35   : > { %s369_s17 = scalar_lea.vmem (!%p354_p1), [#allocation8], %s1569_s11  ;;  %s1574_s7 = scalar_lea.vmem (!%p354_p1), [#allocation9], %s1073_s21 }
  0x36   : > { %p1076_p2 = scmp.ne.s32.totalorder (!%p354_p1), %s1368_s30, 0 }
  0x38   : > { %405 = sbr.rel (%p1076_p2) target bundleno = 266 (0x10a), region = 128 }
  0x3d   : > { %v406_v4 = vld [vmem:[%s1571_s24] sm:$0xff]  ;;  %v407_v5 = vld [vmem:[%s1571_s24 + $0x8] sm:$0xff]  ;;  %v1394_v6 = vmov 0.0   ;;  %vm1395_vm0 = vmmov 0   ;;  %v1396_v9 = vmov 0   ;;  %vm416_vm1 = vcmask 130048  }
  0x3e   : > { %1119 = vmatprep.subr.bf16.mxu0 %v1394_v6  ;;  %463 = vst [vmem:[#allocation4] sm:$0x1] %v1394_v6  ;;  %464 = vst [vmem:[#allocation5] sm:$0xff] %v1394_v6  ;;  %v408_v7 = vpack.c.bf16 %v407_v5, %v406_v4  ;;  %1121 = vmatprep.mubr.msk.bf16.mxu0 %vm1395_vm0, %v1394_v6  ;;  %v410_v8 = vld [vmem:[%s1740_s4] sm:$0xff]  ;;  %v1397_v11 = vmov -inf  }
  0x3f   : > { %465 = vst [vmem:[#allocation5 + $0x8] sm:$0xff] %v1394_v6  ;;  %1265 = vset.pattern.permute.xlu0 %v1396_v9  ;;  %v409_v10 = vld [vmem:[%s1738_s2] sm:$0xf]  ;;  %462 = vst [vmem:[#allocation3] sm:$0x1] %v1397_v11 }
  0x40   : > { %1120 = vmatpush3.bf16.msra.mxu0 %v408_v7  ;;  %413 = vperm.xlu0 %1265, %v410_v8  }
  0x43   : > { %1122 = vmatmul.mubr.msk.bf16.vlgmr.msra.gmra.mxu0 %vm416_vm1, %v409_v10 }
  0xbb   : > { %v414_v12 = vpop.permute.xlu0 %413 }
 0x103   : > { %v454_v13 = vpop.f32.mrf.mxu0 }
 0x104   : > { %v455_v14 = vadd.f32 %v454_v13, %v414_v12 }
 0x105   : > { %v1123_v15 = vpop.f32.mrf.mxu0 }
 0x106   : > { %v460_v16 = vpack.c.bf16 %v455_v14, %v455_v14 }
 0x107   : > { %v457_v17 = vpop.f32.mrf.mxu0 }
 0x108   : > { %461 = vst [vmem:[#allocation2] sm:$0xf] %v460_v16 }
 0x109   : > { %v1124_v18 = vpop.f32.mrf.mxu0 }
 0x10a PF: > { %v466_v19 = vld [vmem:[%s369_s17] sm:$0xff]  ;;  %v467_v20 = vld [vmem:[%s369_s17 + $0x8] sm:$0xff]  ;;  %vm498_vm2 = vcmask 130048   ;;  %v1398_v23 = vmov 0   ;;  %vm620_vm3 = vcmask 1043456   ;;  %vm595_vm4 = vcmask 64512  }
 0x10b   : > { %v468_v21 = vpack.c.bf16 %v467_v20, %v466_v19  ;;  %v1268_v22 = vld [vmem:[%s1739_s3] sm:$0xff]   ;;  %1267 = vset.pattern.permute.xlu1 %v1398_v23  ;;  %1266 = vset.pattern.permute.xlu0 %v1398_v23  ;;  %v473_v24 = vld [vmem:[%s1741_s5 + $0x8] sm:$0xff]  ;;  %v474_v27 = vld [vmem:[%s1741_s5 + $0x10] sm:$0xff]  ;;  %v1399_v59 = vmov 0.0   ;;  %vm1400_vm5 = vmmov 0   ;;  %p1090_p3 = scmp.ne.s32.totalorder %s1368_s30, 1 }
 0x10c   : > { %1127 = vmatprep.mubr.msk.bf16.mxu0 %vm498_vm2, %v1268_v22  ;;  %v1269_v25 = vld [vmem:[%s1739_s3 + $0x8] ss:$0 sps:$4 sm:$0xff]   ;;  %v472_v26 = vld [vmem:[%s1741_s5] sm:$0xff]  ;;  %482 = vperm.xlu1 %1267, %v473_v24   ;;  %s906_s28 = sld [smem:[#allocation6]] (!%p1090_p3) }
 0x10d   : > { %1125 = vmatprep.subr.bf16.mxu0 %v468_v21  ;;  %477 = vperm.xlu0 %1266, %v472_v26  }
 0x10e   : > { %1126 = vmatpush3.bf16.msra.mxu0 %v468_v21 }
 0x10f   : > { %v594_v33 = vld [vmem:[#allocation2] sm:$0xf]  ;;  %1149 = vmatprep.subr.bf16.mxu0 %v1399_v59 }
 0x110   : > { %487 = vperm.xlu1 %1267, %v474_v27   ;;  %1169 = vmatprep.subr.msk.bf16.mxu1 %vm620_vm3, %v594_v33  ;;  %v622_v34 = vsel %vm620_vm3, %v594_v33, 0 }
 0x111   : > { %1128 = vmatmul.mubr.msk.bf16.vlgmr.msra.gmra.mxu0 %vm498_vm2, %v1269_v25  ;;  %1132 = vmatpush3.bf16.msra.mxu1 %v622_v34 }
 0x112   : > { %1165 = vmatprep.mubr.msk.bf16.mxu0 %vm1400_vm5, %v1399_v59 }
 0x188   : > { %v478_v29 = vpop.permute.xlu0 %477 }
 0x1d1   : > { %v1604_v28 = vpop.f32.mrf.mxu0 }
 0x1d3   : > { %v539_v30 = vpop.f32.mrf.mxu0 }
 0x1d4   : > { %v540_v31 = vadd.f32 %v539_v30, %v478_v29  ;;  %v748_v30 = vlaneseq }
 0x1d5   : > { %v1130_v32 = vpop.f32.mrf.mxu0 }
 0x1d6   : > { %553 = vxpose.xlu0.b32.start.end [1/1] (short) %v540_v31, 128  ;;  %v749_v33 = vshrl.u32 %v748_v30, 7 }
 0x252   : > { %v569_v35 = vpop.trf.xlu0 }
 0x256   : > { %v570_v36 = vpop.trf.xlu0 }
 0x257   : > { %v585_v37 = vpack.c.bf16 %v570_v36, %v569_v35  ;;  %v721_v35 = vld [vmem:[#allocation3] sm:$0x1] }
 0x259   : > { %1133 = vmatprep.mubr.msk.bf16.mxu1 %vm595_vm4, %v585_v37  ;;  %v1646_v37 = vsub.s32 0, %v749_v33 }
 0x25a   : > { %v571_v38 = vpop.trf.xlu0 }
 0x25e   : > { %v572_v39 = vpop.trf.xlu0 }
 0x25f   : > { %v586_v40 = vpack.c.bf16 %v572_v39, %v571_v38 }
 0x261   : > { %1134 = vmatmul.mubr.msk.bf16.vlgmr.msra.gmra.mxu1 %vm595_vm4, %v586_v40 }
 0x262   : > { %v573_v41 = vpop.trf.xlu0 }
 0x266   : > { %v574_v42 = vpop.trf.xlu0 }
 0x267   : > { %v587_v43 = vpack.c.bf16 %v574_v42, %v573_v41 }
 0x269   : > { %1137 = vmatprep.mubr.msk.bf16.mxu1 %vm595_vm4, %v587_v43 }
 0x26a   : > { %v575_v44 = vpop.trf.xlu0 }
 0x26e   : > { %v576_v45 = vpop.trf.xlu0 }
 0x26f   : > { %v588_v46 = vpack.c.bf16 %v576_v45, %v575_v44 }
 0x271   : > { %1138 = vmatmul.mubr.msk.bf16.gmra.mxu1 %vm595_vm4, %v588_v46 }
 0x272   : > { %v577_v47 = vpop.trf.xlu0 }
 0x276   : > { %v578_v48 = vpop.trf.xlu0 }
 0x277   : > { %v589_v49 = vpack.c.bf16 %v578_v48, %v577_v47 }
 0x279   : > { %1141 = vmatprep.mubr.msk.bf16.mxu1 %vm595_vm4, %v589_v49 }
 0x27a   : > { %v579_v50 = vpop.trf.xlu0 }
 0x27e   : > { %v580_v51 = vpop.trf.xlu0 }
 0x27f   : > { %v590_v52 = vpack.c.bf16 %v580_v51, %v579_v50 }
 0x281   : > { %1142 = vmatmul.mubr.msk.bf16.gmra.mxu1 %vm595_vm4, %v590_v52 }
 0x282   : > { %v581_v53 = vpop.trf.xlu0 }
 0x286   : > { %v582_v54 = vpop.trf.xlu0 }
 0x287   : > { %v591_v55 = vpack.c.bf16 %v582_v54, %v581_v53 }
 0x289   : > { %1145 = vmatprep.mubr.msk.bf16.mxu1 %vm595_vm4, %v591_v55 }
 0x28a   : > { %v583_v56 = vpop.trf.xlu0 }
 0x28e   : > { %v584_v57 = vpop.trf.xlu0 }
 0x28f   : > { %v592_v58 = vpack.c.bf16 %v584_v57, %v583_v56 }
 0x291   : > { %1146 = vmatmul.mubr.msk.bf16.gmra.mxu1 %vm595_vm4, %v592_v58 }
 0x321   : > { %v1135_v60 = vpop.f32.mrf.mxu1 }
 0x323   : > { %v658_v61 = vpop.f32.mrf.mxu1 }
 0x325   : > { %v1136_v62 = vpop.f32.mrf.mxu1 }
 0x327   : > { %v661_v63 = vpop.f32.mrf.mxu1 }
 0x331   : > { %v1616_v0 = vpop.f32.mrf.mxu1 }
 0x332   : > { %v724_v11 = vmax.f32 %v1135_v60, %v1616_v0 }
 0x333   : > { %v674_v1 = vpop.f32.mrf.mxu1 }
 0x334   : > { %v722_v12 = vmax.f32 %v658_v61, %v674_v1 }
 0x335   : > { %v1618_v2 = vpop.f32.mrf.mxu1 }
 0x336   : > { %v725_v9 = vmax.f32 %v1136_v62, %v1618_v2 }
 0x337   : > { %v677_v3 = vpop.f32.mrf.mxu1 }
 0x338   : > { %v723_v13 = vmax.f32 %v661_v63, %v677_v3 }
 0x341   : > { %v1620_v4 = vpop.f32.mrf.mxu1 }
 0x342   : > { %v728_v16 = vmax.f32 %v724_v11, %v1620_v4 }
 0x343   : > { %v1622_v5 = vpop.f32.mrf.mxu1 }
 0x344   : > { %v726_v17 = vmax.f32 %v722_v12, %v1622_v5 }
 0x345   : > { %v1624_v6 = vpop.f32.mrf.mxu1 }
 0x346   : > { %v729_v14 = vmax.f32 %v725_v9, %v1624_v6 }
 0x347   : > { %v1626_v7 = vpop.f32.mrf.mxu1 }
 0x348   : > { %v727_v18 = vmax.f32 %v723_v13, %v1626_v7 }
 0x351   : > { %v1628_v8 = vpop.f32.mrf.mxu1 }
 0x352   : > { %v732_v21 = vmax.f32 %v728_v16, %v1628_v8 }
 0x353   : > { %v1631_v10 = vpop.f32.mrf.mxu1 }
 0x354   : > { %v730_v22 = vmax.f32 %v726_v17, %v1631_v10 }
 0x355   : > { %v1635_v15 = vpop.f32.mrf.mxu1 }
 0x356   : > { %v733_v19 = vmax.f32 %v729_v14, %v1635_v15 }
 0x357   : > { %v1641_v20 = vpop.f32.mrf.mxu1 }
 0x358   : > { %v731_v23 = vmax.f32 %v727_v18, %v1641_v20  ;;  %v735_v24 = vmax.f32 %v732_v21, %v733_v19 }
 0x35a   : > { %v734_v25 = vmax.f32 %v730_v22, %v731_v23 }
 0x35c   : > { %v736_v26 = vmax.f32 %v734_v25, %v735_v24 }
 0x35e   : > { %v737_v27 = vrot.slane %v736_v26, 4 }
 0x360   : > { %v738_v29 = vmax.f32 %v736_v26, %v737_v27 }
 0x362   : > { %v739_v31 = vrot.slane %v738_v29, 2 }
 0x364   : > { %v740_v32 = vmax.f32 %v738_v29, %v739_v31 }
 0x366   : > { %v741_v34 = vrot.slane %v740_v32, 1 }
 0x368   : > { %v742_v36 = vmax.f32 %v740_v32, %v741_v34 }
 0x36a   : > { %v743_v38 = vmax.f32 %v721_v35, %v742_v36 }
 0x36c   : > { %v744_v39 = vsub.f32 %v721_v35, %v743_v38  ;;  %v751_v40 = vrot.slane %v743_v38, %v1646_v37  ;;  %889 = vst [vmem:[#allocation3] sm:$0x1] %v743_v38 }
 0x36e   : > { %v745_v41 = vmul.f32 1.442695, %v744_v39  ;;  %v753_v42 = vsub.f32 %v658_v61, %v751_v40  ;;  %v754_v43 = vsub.f32 %v661_v63, %v751_v40  ;;  %v755_v44 = vsub.f32 %v1135_v60, %v751_v40 }
 0x36f   : > { %v756_v45 = vsub.f32 %v1136_v62, %v751_v40  ;;  %v757_v48 = vsub.f32 %v674_v1, %v751_v40  ;;  %v758_v50 = vsub.f32 %v677_v3, %v751_v40  ;;  %v759_v52 = vsub.f32 %v1616_v0, %v751_v40 }
 0x370   : > { %1270 = vpow2.f32 %v745_v41  ;;  %v769_v46 = vmul.f32 1.442695, %v753_v42  ;;  %v771_v47 = vmul.f32 1.442695, %v754_v43  ;;  %v773_v49 = vmul.f32 1.442695, %v755_v44 }
 0x371   : > { %v775_v51 = vmul.f32 1.442695, %v756_v45  ;;  %v760_v53 = vsub.f32 %v1618_v2, %v751_v40  ;;  %v777_v54 = vmul.f32 1.442695, %v757_v48  ;;  %v761_v55 = vsub.f32 %v1622_v5, %v751_v40 }
 0x372   : > { %1272 = vpow2.f32 %v769_v46  ;;  %v762_v56 = vsub.f32 %v1626_v7, %v751_v40  ;;  %v779_v57 = vmul.f32 1.442695, %v758_v50  ;;  %v767_v58 = vsub.f32 %v1628_v8, %v751_v40 }
 0x373   : > { %1274 = vpow2.f32 %v771_v47  ;;  %v781_v60 = vmul.f32 1.442695, %v759_v52  ;;  %v768_v61 = vsub.f32 %v1635_v15, %v751_v40  ;;  %v783_v62 = vmul.f32 1.442695, %v760_v53  ;;  %v483_v53 = vpop.permute.xlu1 %482 }
 0x374   : > { %1276 = vpow2.f32 %v773_v49  ;;  %v765_v63 = vsub.f32 %v1631_v10, %v751_v40  ;;  %v785_v0 = vmul.f32 1.442695, %v761_v55  ;;  %v766_v2 = vsub.f32 %v1641_v20, %v751_v40 }
 0x375   : > { %1278 = vpow2.f32 %v775_v51  ;;  %v787_v3 = vmul.f32 1.442695, %v762_v56  ;;  %v797_v5 = vmul.f32 1.442695, %v767_v58  ;;  %v763_v8 = vsub.f32 %v1620_v4, %v751_v40  ;;  %v542_v58 = vpop.f32.mrf.mxu0 }
 0x376   : > { %1280 = vpow2.f32 %v777_v54  ;;  %v799_v9 = vmul.f32 1.442695, %v768_v61  ;;  %v793_v11 = vmul.f32 1.442695, %v765_v63  ;;  %v764_v12 = vsub.f32 %v1624_v6, %v751_v40 }
 0x377   : > { %1282 = vpow2.f32 %v779_v57  ;;  %v795_v13 = vmul.f32 1.442695, %v766_v2  ;;  %v789_v15 = vmul.f32 1.442695, %v763_v8  ;;  %v801_v57 = vld [vmem:[#allocation4] sm:$0x1]  ;;  %v543_v2 = vadd.f32 %v542_v58, %v483_v53 }
 0x378   : > { %1284 = vpow2.f32 %v781_v60  ;;  %v791_v4 = vmul.f32 1.442695, %v764_v12 }
 0x379   : > { %1286 = vpow2.f32 %v783_v62  ;;  %v488_v62 = vpop.permute.xlu1 %487 }
 0x37a   : > { %1288 = vpow2.f32 %v785_v0  ;;  %v548_v8 = vadd.f32 %v1604_v28, %v488_v62 }
 0x37b   : > { %1290 = vpow2.f32 %v787_v3 }
 0x37c   : > { %1292 = vpow2.f32 %v797_v5 }
 0x37d   : > { %v1656_v1 = vpop.eup %1270  ;;  %1294 = vpow2.f32 %v799_v9  ;;  %v593_v9 = vpack.c.bf16 %v548_v8, %v543_v2 }
 0x37e   : > { %v1661_v7 = vrot.slane %v1656_v1, %v1646_v37  ;;  %1296 = vpow2.f32 %v793_v11  ;;  %v802_v63 = vmul.f32 %v1656_v1, %v801_v57  ;;  %v826_v11 = vld [vmem:[#allocation5] sm:$0xff]  ;;  %v827_v1 = vld [vmem:[#allocation5 + $0x8] sm:$0xff] }
 0x37f   : > { %v1664_v10 = vpop.eup %1272  ;;  %1298 = vpow2.f32 %v795_v13 }
 0x380   : > { %v1667_v14 = vpop.eup %1274  ;;  %1300 = vpow2.f32 %v789_v15  ;;  %v834_v12 = vmul.f32 %v1661_v7, %v826_v11 }
 0x381   : > { %v803_v16 = vadd.f32 %v1667_v14, %v1664_v10  ;;  %v1671_v17 = vpop.eup %1276  ;;  %1302 = vpow2.f32 %v791_v4  ;;  %v836_v5 = vpack.c.bf16 %v1667_v14, %v1664_v10 }
 0x382   : > { %v1279_v19 = vpop.eup %1278 }
 0x383   : > { %v804_v18 = vadd.f32 %v1671_v17, %v803_v16  ;;  %v1281_v20 = vpop.eup %1280  ;;  %v837_v61 = vpack.c.bf16 %v1279_v19, %v1671_v17 }
 0x384   : > { %v1283_v22 = vpop.eup %1282 }
 0x385   : > { %v805_v6 = vadd.f32 %v1279_v19, %v804_v18  ;;  %v1285_v23 = vpop.eup %1284  ;;  %v838_v55 = vpack.c.bf16 %v1283_v22, %v1281_v20 }
 0x386   : > { %v1287_v25 = vpop.eup %1286 }
 0x387   : > { %v806_v21 = vadd.f32 %v1281_v20, %v805_v6  ;;  %v1289_v26 = vpop.eup %1288  ;;  %v839_v51 = vpack.c.bf16 %v1287_v25, %v1285_v23 }
 0x388   : > { %v1291_v29 = vpop.eup %1290 }
 0x389   : > { %v807_v24 = vadd.f32 %v1283_v22, %v806_v21  ;;  %v1293_v30 = vpop.eup %1292  ;;  %v840_v48 = vpack.c.bf16 %v1291_v29, %v1289_v26 }
 0x38a   : > { %v1295_v32 = vpop.eup %1294 }
 0x38b   : > { %v808_v27 = vadd.f32 %v1285_v23, %v807_v24  ;;  %v1297_v33 = vpop.eup %1296  ;;  %v843_v35 = vpack.c.bf16 %v1295_v32, %v1293_v30 }
 0x38c   : > { %v1299_v36 = vpop.eup %1298 }
 0x38d   : > { %v809_v31 = vadd.f32 %v1287_v25, %v808_v27  ;;  %1150 = vmatpush3.bf16.msra.mxu0 %v843_v35  ;;  %v1301_v39 = vpop.eup %1300  ;;  %v842_v41 = vpack.c.bf16 %v1299_v36, %v1297_v33 }
 0x38e   : > { %1151 = vmatprep.subr.bf16.mxu0 %v1399_v59  ;;  %v1303_v42 = vpop.eup %1302 }
 0x38f   : > { %v810_v34 = vadd.f32 %v1289_v26, %v809_v31  ;;  %v841_v45 = vpack.c.bf16 %v1303_v42, %v1301_v39 }
 0x391   : > { %v811_v38 = vadd.f32 %v1291_v29, %v810_v34  ;;  %1152 = vmatpush3.bf16.msra.mxu0 %v842_v41 }
 0x392   : > { %1153 = vmatprep.subr.bf16.mxu0 %v1399_v59 }
 0x393   : > { %v812_v40 = vadd.f32 %v1301_v39, %v811_v38 }
 0x395   : > { %v813_v43 = vadd.f32 %v1303_v42, %v812_v40  ;;  %1154 = vmatpush3.bf16.msra.mxu0 %v841_v45 }
 0x396   : > { %1155 = vmatprep.subr.bf16.mxu0 %v1399_v59 }
 0x397   : > { %v814_v44 = vadd.f32 %v1297_v33, %v813_v43 }
 0x399   : > { %v815_v46 = vadd.f32 %v1299_v36, %v814_v44  ;;  %1156 = vmatpush3.bf16.msra.mxu0 %v840_v48 }
 0x39a   : > { %1157 = vmatprep.subr.bf16.mxu0 %v1399_v59 }
 0x39b   : > { %v816_v47 = vadd.f32 %v1293_v30, %v815_v46 }
 0x39d   : > { %v817_v49 = vadd.f32 %v1295_v32, %v816_v47  ;;  %1158 = vmatpush3.bf16.msra.mxu0 %v839_v51 }
 0x39e   : > { %1159 = vmatprep.subr.bf16.mxu0 %v1399_v59 }
 0x39f   : > { %v818_v50 = vrot.slane %v817_v49, 4 }
 0x3a1   : > { %v819_v52 = vadd.f32 %v818_v50, %v817_v49  ;;  %1160 = vmatpush3.bf16.msra.mxu0 %v838_v55 }
 0x3a2   : > { %1161 = vmatprep.subr.bf16.mxu0 %v1399_v59 }
 0x3a3   : > { %v820_v54 = vrot.slane %v819_v52, 2 }
 0x3a5   : > { %v821_v56 = vadd.f32 %v820_v54, %v819_v52  ;;  %1162 = vmatpush3.bf16.msra.mxu0 %v837_v61 }
 0x3a6   : > { %1163 = vmatprep.subr.bf16.mxu0 %v1399_v59  ;;  %v835_v59 = vmul.f32 %v1661_v7, %v827_v1 }
 0x3a7   : > { %v822_v60 = vrot.slane %v821_v56, 1 }
 0x3a9   : > { %v823_v0 = vadd.f32 %v822_v60, %v821_v56  ;;  %1164 = vmatpush3.bf16.msra.mxu0 %v836_v5 }
 0x3ab   : > { %v824_v3 = vadd.f32 %v823_v0, %v802_v63 }
 0x3ac   : > { %1166 = vmatmul.mubr.bf16.vlgmr.msra.gmra.mxu0 %v593_v9 }
 0x3ad   : > { %825 = vst [vmem:[#allocation4] sm:$0x1] %v824_v3 }
 0x46c   : > { %v878_v13 = vpop.f32.mrf.mxu0 }
 0x46d   : > { %v885_v15 = vadd.f32 %v878_v13, %v834_v12 }
 0x46e   : > { %v1167_v16 = vpop.f32.mrf.mxu0 }
 0x46f   : > { %887 = vst [vmem:[#allocation5] sm:$0xff] %v885_v15  ;;  %893 = sbr.rel (%p1090_p3) target bundleno = 1164 (0x48c), region = 132 }
 0x470   : > { %v881_v17 = vpop.f32.mrf.mxu0 }
 0x471   : > { %v886_v4 = vadd.f32 %v881_v17, %v835_v59 }
 0x472   : > { %v1168_v18 = vpop.f32.mrf.mxu0 }
 0x473   : > { %888 = vst [vmem:[#allocation5 + $0x8] sm:$0xff] %v886_v4 }
 0x474   : > { %v894_v28 = vld [vmem:[#allocation4] sm:$0x1]  ;;  %v907_v7 = vstv %s906_s28  ;;  %v910_v22 = vld [vmem:[%s1571_s24] sm:$0xff] }
 0x475   : > { %1304 = vrcp.f32 %v894_v28  ;;  %v911_v23 = vld [vmem:[%s1571_s24 + $0x8] sm:$0xff] }
 0x476   : > { %v896_v14 = vld [vmem:[#allocation5] sm:$0xff] }
 0x47a   : > { %v897_v19 = vld [vmem:[#allocation5 + $0x8] sm:$0xff] }
 0x482   : > { %v1305_v10 = vpop.eup %1304 }
 0x483   : > { %v902_v6 = vrot.slane %v1305_v10, %v1646_v37 }
 0x485   : > { %v904_v20 = vmul.f32 %v902_v6, %v896_v14  ;;  %v905_v21 = vmul.f32 %v902_v6, %v897_v19 }
 0x487   : > { %v908_v24 = vmul.f32 %v907_v7, %v904_v20  ;;  %v909_v25 = vmul.f32 %v907_v7, %v905_v21 }
 0x489   : > { %v912_v26 = vadd.f32 %v910_v22, %v908_v24  ;;  %v913_v27 = vadd.f32 %v911_v23, %v909_v25 }
 0x48b   : > { %914 = vst [vmem:[%s1574_s7] sm:$0xff] %v912_v26  ;;  %915 = vst [vmem:[%s1574_s7 + $0x8] sm:$0xff] %v913_v27 }
 0x48c PF: > { %922 = sbr.rel (!%p1535_p9) target bundleno = 1174 (0x496), region = 136  ;;  %s1757_s30 = sld [smem:[#allocation10_spill]] (%p1535_p9) }
 0x48d   : > { %s1092_s15 = sshll.u32 (%p1535_p9), %s1376_s9, 2  ;;  %s1758_s18 = sld [smem:[#allocation15_spill]] (%p1535_p9) }
 0x492   : > { %s924_s25 = sadd.s32 %s1757_s30, %s1092_s15  ;;  %v957_v37 = vld [vmem:[%s1574_s7] sm:$0xff]  ;;  %v959_v29 = vld [vmem:[%s1574_s7 + $0x8] sm:$0xff] }
 0x493   : > { %s1093_s19 = sshll.u32 %s924_s25, 3 }
 0x494   : > { %s926_s8 = scalar_lea.vmem %s1758_s18, %s1093_s19 }
 0x495   : > { %958 = vst [vmem:[%s926_s8] sm:$0xff] %v957_v37  ;;  %960 = vst [vmem:[%s926_s8 + $0x10] sm:$0xff] %v959_v29 }
 0x496 PF: > { %s18_s6 = sadd.s32 1, %s1392_s6   ;;  %s1759_s8 = sld [smem:[#allocation11_spill]] }
 0x497   : > { %p15_p4 = scmp.ge.s32.totalorder %s18_s6, 10   ;;  %s1760_s22 = sld [smem:[#allocation12_spill]] }
 0x498   : > { %s1761_s11 = sld [smem:[#allocation13_spill]]  ;;  %s1763_s26 = smov %s1356_s27 }
 0x499   : > { %s1762_s7 = sld [smem:[#allocation14_spill]]  ;;  %s1764_s27 = smov %s1546_s14 }
 0x49a   : > { %s1765_s28 = smov %s1364_s29  ;;  %s1766_s29 = smov %s1543_s16 }
 0x49b   : > { %s1767_s30 = smov %s1380_s10  ;;  %s1768_s9 = smov %s1388_s12 }
 0x49c   :  { %17 = sbr.rel (!%p15_p4) target bundleno = 9 (0x9), region = 213 }
 0x49d   : > { %s1769_s10 = smov %s1760_s22 }
 0x49f   : > { %s1770_s12 = smov %s1762_s7 }

</bundles_post_ra>
